<compile_context>
chip_gen: v7x
topology: tpu7x:2x2x1
jax: 0.10.0
libtpu: 0.0.40
codegen_flags: <defaults>
</compile_context>

<pallas_src>
import functools

import jax
import jax.numpy as jnp
from jax.experimental import pallas as pl
from jax.experimental.pallas import tpu as pltpu


def gru_fused_kernel(T, B, H,
                     x_ref,          # (T*B, I)  time-major flattened input
                     wih_rz_ref,     # (I, 2H)   input->r,z weights (pre-transposed)
                     wih_n_ref,      # (I, H)    input->n weights  (pre-transposed)
                     b_rz_ref,       # (1, 2H)   b_ir+b_hr | b_iz+b_hz (pre-folded)
                     b_in_ref,       # (1, H)    b_in
                     whh_rz_ref,     # (H, 2H)   hidden->r,z weights (pre-transposed)
                     whh_n_ref,      # (H, H)    hidden->n weights   (pre-transposed)
                     b_hn_ref,       # (1, H)    b_hn (must stay inside r*(.))
                     w1_t_ref,       # (H, FC)
                     b1_ref,         # (1, FC)
                     w2_t_ref,       # (FC, O)
                     b2_ref,         # (1, O)
                     r_out_ref,      # (B, T*H)  all hidden states, batch-first, lane-dense
                     logp_ref):      # (B, O)    log_softmax(fc2(relu(fc1(h_T))))
    # --- one-shot lane-dense input projection for every timestep (kept in vregs) ---
    x = x_ref[...]
    gx_rz = (jnp.dot(x, wih_rz_ref[...], preferred_element_type=jnp.float32)
             + b_rz_ref[...])                                   # (T*B, 2H), biases folded
    gx_n = (jnp.dot(x, wih_n_ref[...], preferred_element_type=jnp.float32)
            + b_in_ref[...])                                    # (T*B, H)

    whh_rz = whh_rz_ref[...]
    whh_n = whh_n_ref[...]
    b_hn = b_hn_ref[...]

    # --- serial recurrence; fully unrolled, all offsets static ---
    h = jnp.zeros((B, H), jnp.float32)                          # h0 = None -> zeros
    for t in range(T):
        gh_rz = jnp.dot(h, whh_rz, preferred_element_type=jnp.float32)      # (B, 2H)
        gh_n = jnp.dot(h, whh_n, preferred_element_type=jnp.float32) + b_hn  # (B, H)
        rz = jax.nn.sigmoid(gx_rz[t * B:(t + 1) * B, :] + gh_rz)  # one fused EUP sigmoid
        r = rz[:, :H]                                             # lane offset 0
        z = rz[:, H:]                                             # one lane shift / step
        n = jnp.tanh(gx_n[t * B:(t + 1) * B, :] + r * gh_n)       # all operands at offset 0
        h = n + z * (h - n)                                       # == (1-z)*n + z*h
        r_out_ref[:, t * H:(t + 1) * H] = h                       # batch-first, static store

    # --- fused FC head: fc1 -> ReLU -> fc2 -> log_softmax ---
    y1 = jnp.maximum(
        jnp.dot(h, w1_t_ref[...], preferred_element_type=jnp.float32) + b1_ref[...], 0.0)
    logits = jnp.dot(y1, w2_t_ref[...], preferred_element_type=jnp.float32) + b2_ref[...]
    m = jnp.max(logits, axis=1, keepdims=True)
    lse = jnp.log(jnp.sum(jnp.exp(logits - m), axis=1, keepdims=True)) + m
    logp_ref[...] = logits - lse


def init_params(key, input_size, hidden_size, fc_hidden_size, output_size):
    """Deterministic synthetic parameters in PyTorch layouts (as nn.GRU / nn.Linear store them)."""
    ks = jax.random.split(key, 8)
    s_i = 1.0 / jnp.sqrt(float(hidden_size))
    wih = jax.random.normal(ks[0], (3 * hidden_size, input_size), jnp.float32) * s_i
    whh = jax.random.normal(ks[1], (3 * hidden_size, hidden_size), jnp.float32) * s_i
    bih = jax.random.normal(ks[2], (3 * hidden_size,), jnp.float32) * s_i
    bhh = jax.random.normal(ks[3], (3 * hidden_size,), jnp.float32) * s_i
    w1 = jax.random.normal(ks[4], (fc_hidden_size, hidden_size), jnp.float32) / jnp.sqrt(float(hidden_size))
    b1 = jax.random.normal(ks[5], (fc_hidden_size,), jnp.float32) * 0.1
    w2 = jax.random.normal(ks[6], (output_size, fc_hidden_size), jnp.float32) / jnp.sqrt(float(fc_hidden_size))
    b2 = jax.random.normal(ks[7], (output_size,), jnp.float32) * 0.1
    return (wih, whh, bih, bhh, w1, b1, w2, b2)


def prepare_params(params):
    """One-time layout plumbing, hoisted out of the per-call path.

    Splits the stacked [r|z|n] gate weights into an rz block and an n block (lane-aligned),
    pre-transposes everything to (in, out), reshapes biases to (1, dim), and folds
    b_hr / b_hz into the input-projection bias.
    """
    wih, whh, bih, bhh, w1, b1, w2, b2 = params
    H = whh.shape[1]
    wih_rz_t = jnp.asarray(wih[:2 * H].T)            # (I, 2H)
    wih_n_t = jnp.asarray(wih[2 * H:].T)             # (I, H)
    whh_rz_t = jnp.asarray(whh[:2 * H].T)            # (H, 2H)
    whh_n_t = jnp.asarray(whh[2 * H:].T)             # (H, H)
    b_rz = (bih[:2 * H] + bhh[:2 * H]).reshape(1, 2 * H)
    b_in = bih[2 * H:].reshape(1, H)
    b_hn = bhh[2 * H:].reshape(1, H)
    w1_t = jnp.asarray(w1.T)                         # (H, FC)
    w2_t = jnp.asarray(w2.T)                         # (FC, O)
    return (wih_rz_t, wih_n_t, b_rz, b_in, whh_rz_t, whh_n_t, b_hn,
            w1_t, b1.reshape(1, -1), w2_t, b2.reshape(1, -1))


@jax.jit
def gru_forward(x, kparams):
    (wih_rz_t, wih_n_t, b_rz, b_in, whh_rz_t, whh_n_t, b_hn,
     w1_t, b1, w2_t, b2) = kparams
    B, T, I = x.shape
    H = whh_n_t.shape[0]
    FC = w1_t.shape[1]
    O = w2_t.shape[1]

    # glue (inside jit): time-major flatten so every per-step read in the kernel is a
    # contiguous sublane block [t*B : (t+1)*B).  4 KB copy, fused into the jitted program.
    x_tm = jnp.transpose(x, (1, 0, 2)).reshape(T * B, I)

    flops = (2 * T * B * I * 3 * H + T * 2 * B * H * 3 * H
             + 2 * B * H * FC + 2 * B * FC * O)
    transcendentals = T * B * 3 * H + B * O + B
    bytes_accessed = 4 * (T * B * I + I * 3 * H + 3 * H + H * 3 * H + 2 * H
                          + H * FC + FC + FC * O + O + B * T * H + B * O)

    vmem = pl.BlockSpec(memory_space=pltpu.MemorySpace.VMEM)
    r_out_flat, logp = pl.pallas_call(
        functools.partial(gru_fused_kernel, T, B, H),
        out_shape=(
            jax.ShapeDtypeStruct((B, T * H), jnp.float32),   # r_out, batch-first, lane-dense
            jax.ShapeDtypeStruct((B, O), jnp.float32),       # log-probs
        ),
        in_specs=[vmem] * 12,
        out_specs=(vmem, vmem),
        cost_estimate=pl.CostEstimate(flops=flops,
                                      transcendentals=transcendentals,
                                      bytes_accessed=bytes_accessed),
    )(x_tm,
      wih_rz_t, wih_n_t, b_rz, b_in,
      whh_rz_t, whh_n_t, b_hn,
      w1_t, b1, w2_t, b2)

    # free bitcast: (B, T*H) -> (B, T, H) batch_first, as nn.GRU(batch_first=True) returns
    r_out = r_out_flat.reshape(B, T, H)
    return r_out, logp


def gru_reference(x, params):
    """Pure-JAX reference mirroring the PyTorch forward (unidirectional, 1 layer)."""
    wih, whh, bih, bhh, w1, b1, w2, b2 = params
    B, T, I = x.shape
    H = whh.shape[1]
    h = jnp.zeros((B, H), jnp.float32)
    outs = []
    for t in range(T):
        xt = x[:, t, :]
        gx = xt @ wih.T + bih
        gh = h @ whh.T + bhh
        r = jax.nn.sigmoid(gx[:, :H] + gh[:, :H])
        z = jax.nn.sigmoid(gx[:, H:2 * H] + gh[:, H:2 * H])
        n = jnp.tanh(gx[:, 2 * H:] + r * gh[:, 2 * H:])
        h = (1.0 - z) * n + z * h
        outs.append(h)
    r_out = jnp.stack(outs, axis=1)                      # (B, T, H)
    last = r_out[:, -1, :]
    y = jnp.maximum(last @ w1.T + b1, 0.0)
    logits = y @ w2.T + b2
    logp = jax.nn.log_softmax(logits, axis=1)
    return r_out, logp


if __name__ == "__main__":
    # Module config: GRU(input_size, hidden_size, fc_hidden_size, output_size,
    #                    bidirectional=False, num_layers=1, dropout=0.0)
    batch, seq = 8, 8
    input_size, hidden_size, fc_hidden_size, output_size = 16, 32, 64, 8

    key = jax.random.PRNGKey(0)
    k_x, k_p = jax.random.split(key)
    x = jax.random.normal(k_x, (batch, seq, input_size), jnp.float32)
    params = init_params(k_p, input_size, hidden_size, fc_hidden_size, output_size)
    kparams = prepare_params(params)            # one-time layout plumbing (hoisted)

    r_out, logp = gru_forward(x, kparams)
    jax.block_until_ready((r_out, logp))

    r_ref, lp_ref = gru_reference(x, params)
    assert r_out.shape == (batch, seq, hidden_size)
    assert logp.shape == (batch, output_size)
    assert jnp.allclose(r_out, r_ref, rtol=1e-3, atol=1e-4)
    assert jnp.allclose(logp, lp_ref, rtol=1e-3, atol=1e-4)

    print("KERNEL_OK")
</pallas_src>

<mosaic_0001>
module attributes {stable_mosaic.version = 11 : i64} {
  func.func @gru_fused_kernel(%arg0: memref<64x16xf32, #tpu.memory_space<vmem>>, %arg1: memref<16x64xf32, #tpu.memory_space<vmem>>, %arg2: memref<16x32xf32, #tpu.memory_space<vmem>>, %arg3: memref<1x64xf32, #tpu.memory_space<vmem>>, %arg4: memref<1x32xf32, #tpu.memory_space<vmem>>, %arg5: memref<32x64xf32, #tpu.memory_space<vmem>>, %arg6: memref<32x32xf32, #tpu.memory_space<vmem>>, %arg7: memref<1x32xf32, #tpu.memory_space<vmem>>, %arg8: memref<32x64xf32, #tpu.memory_space<vmem>>, %arg9: memref<1x64xf32, #tpu.memory_space<vmem>>, %arg10: memref<64x8xf32, #tpu.memory_space<vmem>>, %arg11: memref<1x8xf32, #tpu.memory_space<vmem>>, %arg12: memref<8x256xf32, #tpu.memory_space<vmem>>, %arg13: memref<8x8xf32, #tpu.memory_space<vmem>>) attributes {dimension_semantics = [], scalar_prefetch = 0 : i64, scratch_operands = 0 : i64, tpu.core_type = #tpu.core_type<tc>} {
    %c0 = arith.constant 0 : index
    %c0_0 = arith.constant 0 : index
    %0 = vector.load %arg0[%c0, %c0_0] : memref<64x16xf32, #tpu.memory_space<vmem>>, vector<64x16xf32>
    %c0_1 = arith.constant 0 : index
    %c0_2 = arith.constant 0 : index
    %1 = vector.load %arg1[%c0_1, %c0_2] : memref<16x64xf32, #tpu.memory_space<vmem>>, vector<16x64xf32>
    %cst = arith.constant dense<0.000000e+00> : vector<64x64xf32>
    %2 = tpu.matmul %0, %1, %cst {dimension_numbers = #tpu.dot_dimension_numbers<[1], [0], [0], [1], [0, 0, 1, 1], [], []>} : vector<64x16xf32>, vector<16x64xf32>, vector<64x64xf32> -> vector<64x64xf32>
    %c0_3 = arith.constant 0 : index
    %c0_4 = arith.constant 0 : index
    %3 = vector.load %arg3[%c0_3, %c0_4] : memref<1x64xf32, #tpu.memory_space<vmem>>, vector<1x64xf32>
    %4 = vector.broadcast %3 : vector<1x64xf32> to vector<64x64xf32>
    %5 = arith.addf %2, %4 : vector<64x64xf32>
    %c0_5 = arith.constant 0 : index
    %c0_6 = arith.constant 0 : index
    %6 = vector.load %arg2[%c0_5, %c0_6] : memref<16x32xf32, #tpu.memory_space<vmem>>, vector<16x32xf32>
    %cst_7 = arith.constant dense<0.000000e+00> : vector<64x32xf32>
    %7 = tpu.matmul %0, %6, %cst_7 {dimension_numbers = #tpu.dot_dimension_numbers<[1], [0], [0], [1], [0, 0, 1, 1], [], []>} : vector<64x16xf32>, vector<16x32xf32>, vector<64x32xf32> -> vector<64x32xf32>
    %c0_8 = arith.constant 0 : index
    %c0_9 = arith.constant 0 : index
    %8 = vector.load %arg4[%c0_8, %c0_9] : memref<1x32xf32, #tpu.memory_space<vmem>>, vector<1x32xf32>
    %9 = vector.broadcast %8 : vector<1x32xf32> to vector<64x32xf32>
    %10 = arith.addf %7, %9 : vector<64x32xf32>
    %c0_10 = arith.constant 0 : index
    %c0_11 = arith.constant 0 : index
    %11 = vector.load %arg5[%c0_10, %c0_11] : memref<32x64xf32, #tpu.memory_space<vmem>>, vector<32x64xf32>
    %c0_12 = arith.constant 0 : index
    %c0_13 = arith.constant 0 : index
    %12 = vector.load %arg6[%c0_12, %c0_13] : memref<32x32xf32, #tpu.memory_space<vmem>>, vector<32x32xf32>
    %c0_14 = arith.constant 0 : index
    %c0_15 = arith.constant 0 : index
    %13 = vector.load %arg7[%c0_14, %c0_15] : memref<1x32xf32, #tpu.memory_space<vmem>>, vector<1x32xf32>
    %cst_16 = arith.constant 0.000000e+00 : f32
    %14 = vector.broadcast %cst_16 : f32 to vector<8x32xf32>
    %cst_17 = arith.constant dense<0.000000e+00> : vector<8x64xf32>
    %15 = tpu.matmul %14, %11, %cst_17 {dimension_numbers = #tpu.dot_dimension_numbers<[1], [0], [0], [1], [0, 0, 1, 1], [], []>} : vector<8x32xf32>, vector<32x64xf32>, vector<8x64xf32> -> vector<8x64xf32>
    %cst_18 = arith.constant dense<0.000000e+00> : vector<8x32xf32>
    %16 = tpu.matmul %14, %12, %cst_18 {dimension_numbers = #tpu.dot_dimension_numbers<[1], [0], [0], [1], [0, 0, 1, 1], [], []>} : vector<8x32xf32>, vector<32x32xf32>, vector<8x32xf32> -> vector<8x32xf32>
    %17 = vector.broadcast %13 : vector<1x32xf32> to vector<8x32xf32>
    %18 = arith.addf %16, %17 : vector<8x32xf32>
    %19 = vector.extract_strided_slice %5 {offsets = [0, 0], sizes = [8, 64], strides = [1, 1]} : vector<64x64xf32> to vector<8x64xf32>
    %20 = arith.addf %19, %15 : vector<8x64xf32>
    %21 = arith.negf %20 : vector<8x64xf32>
    %22 = math.exp %21 : vector<8x64xf32>
    %cst_19 = arith.constant 1.000000e+00 : f32
    %23 = vector.broadcast %cst_19 : f32 to vector<8x64xf32>
    %24 = arith.addf %23, %22 : vector<8x64xf32>
    %25 = arith.divf %23, %24 : vector<8x64xf32>
    %26 = vector.extract_strided_slice %25 {offsets = [0, 0], sizes = [8, 32], strides = [1, 1]} : vector<8x64xf32> to vector<8x32xf32>
    %27 = vector.extract_strided_slice %25 {offsets = [0, 32], sizes = [8, 32], strides = [1, 1]} : vector<8x64xf32> to vector<8x32xf32>
    %28 = vector.extract_strided_slice %10 {offsets = [0, 0], sizes = [8, 32], strides = [1, 1]} : vector<64x32xf32> to vector<8x32xf32>
    %29 = arith.mulf %26, %18 : vector<8x32xf32>
    %30 = arith.addf %28, %29 : vector<8x32xf32>
    %31 = math.tanh %30 : vector<8x32xf32>
    %32 = arith.subf %14, %31 : vector<8x32xf32>
    %33 = arith.mulf %27, %32 : vector<8x32xf32>
    %34 = arith.addf %31, %33 : vector<8x32xf32>
    %c0_20 = arith.constant 0 : index
    %c0_21 = arith.constant 0 : index
    %35 = vector.load %arg12[%c0_20, %c0_21] : memref<8x256xf32, #tpu.memory_space<vmem>>, vector<8x32xf32>
    tpu.vector_store %arg12[%c0_20, %c0_21], %34 {strides = array<i32>} : memref<8x256xf32, #tpu.memory_space<vmem>>, vector<8x32xf32>,
    %cst_22 = arith.constant dense<0.000000e+00> : vector<8x64xf32>
    %36 = tpu.matmul %34, %11, %cst_22 {dimension_numbers = #tpu.dot_dimension_numbers<[1], [0], [0], [1], [0, 0, 1, 1], [], []>} : vector<8x32xf32>, vector<32x64xf32>, vector<8x64xf32> -> vector<8x64xf32>
    %cst_23 = arith.constant dense<0.000000e+00> : vector<8x32xf32>
    %37 = tpu.matmul %34, %12, %cst_23 {dimension_numbers = #tpu.dot_dimension_numbers<[1], [0], [0], [1], [0, 0, 1, 1], [], []>} : vector<8x32xf32>, vector<32x32xf32>, vector<8x32xf32> -> vector<8x32xf32>
    %38 = vector.broadcast %13 : vector<1x32xf32> to vector<8x32xf32>
    %39 = arith.addf %37, %38 : vector<8x32xf32>
    %40 = vector.extract_strided_slice %5 {offsets = [8, 0], sizes = [8, 64], strides = [1, 1]} : vector<64x64xf32> to vector<8x64xf32>
    %41 = arith.addf %40, %36 : vector<8x64xf32>
    %42 = arith.negf %41 : vector<8x64xf32>
    %43 = math.exp %42 : vector<8x64xf32>
    %cst_24 = arith.constant 1.000000e+00 : f32
    %44 = vector.broadcast %cst_24 : f32 to vector<8x64xf32>
    %45 = arith.addf %44, %43 : vector<8x64xf32>
    %46 = arith.divf %44, %45 : vector<8x64xf32>
    %47 = vector.extract_strided_slice %46 {offsets = [0, 0], sizes = [8, 32], strides = [1, 1]} : vector<8x64xf32> to vector<8x32xf32>
    %48 = vector.extract_strided_slice %46 {offsets = [0, 32], sizes = [8, 32], strides = [1, 1]} : vector<8x64xf32> to vector<8x32xf32>
    %49 = vector.extract_strided_slice %10 {offsets = [8, 0], sizes = [8, 32], strides = [1, 1]} : vector<64x32xf32> to vector<8x32xf32>
    %50 = arith.mulf %47, %39 : vector<8x32xf32>
    %51 = arith.addf %49, %50 : vector<8x32xf32>
    %52 = math.tanh %51 : vector<8x32xf32>
    %53 = arith.subf %34, %52 : vector<8x32xf32>
    %54 = arith.mulf %48, %53 : vector<8x32xf32>
    %55 = arith.addf %52, %54 : vector<8x32xf32>
    %c0_25 = arith.constant 0 : index
    %c32 = arith.constant 32 : index
    %56 = vector.load %arg12[%c0_25, %c32] : memref<8x256xf32, #tpu.memory_space<vmem>>, vector<8x32xf32>
    tpu.vector_store %arg12[%c0_25, %c32], %55 {strides = array<i32>} : memref<8x256xf32, #tpu.memory_space<vmem>>, vector<8x32xf32>,
    %cst_26 = arith.constant dense<0.000000e+00> : vector<8x64xf32>
    %57 = tpu.matmul %55, %11, %cst_26 {dimension_numbers = #tpu.dot_dimension_numbers<[1], [0], [0], [1], [0, 0, 1, 1], [], []>} : vector<8x32xf32>, vector<32x64xf32>, vector<8x64xf32> -> vector<8x64xf32>
    %cst_27 = arith.constant dense<0.000000e+00> : vector<8x32xf32>
    %58 = tpu.matmul %55, %12, %cst_27 {dimension_numbers = #tpu.dot_dimension_numbers<[1], [0], [0], [1], [0, 0, 1, 1], [], []>} : vector<8x32xf32>, vector<32x32xf32>, vector<8x32xf32> -> vector<8x32xf32>
    %59 = vector.broadcast %13 : vector<1x32xf32> to vector<8x32xf32>
    %60 = arith.addf %58, %59 : vector<8x32xf32>
    %61 = vector.extract_strided_slice %5 {offsets = [16, 0], sizes = [8, 64], strides = [1, 1]} : vector<64x64xf32> to vector<8x64xf32>
    %62 = arith.addf %61, %57 : vector<8x64xf32>
    %63 = arith.negf %62 : vector<8x64xf32>
    %64 = math.exp %63 : vector<8x64xf32>
    %cst_28 = arith.constant 1.000000e+00 : f32
    %65 = vector.broadcast %cst_28 : f32 to vector<8x64xf32>
    %66 = arith.addf %65, %64 : vector<8x64xf32>
    %67 = arith.divf %65, %66 : vector<8x64xf32>
    %68 = vector.extract_strided_slice %67 {offsets = [0, 0], sizes = [8, 32], strides = [1, 1]} : vector<8x64xf32> to vector<8x32xf32>
    %69 = vector.extract_strided_slice %67 {offsets = [0, 32], sizes = [8, 32], strides = [1, 1]} : vector<8x64xf32> to vector<8x32xf32>
    %70 = vector.extract_strided_slice %10 {offsets = [16, 0], sizes = [8, 32], strides = [1, 1]} : vector<64x32xf32> to vector<8x32xf32>
    %71 = arith.mulf %68, %60 : vector<8x32xf32>
    %72 = arith.addf %70, %71 : vector<8x32xf32>
    %73 = math.tanh %72 : vector<8x32xf32>
    %74 = arith.subf %55, %73 : vector<8x32xf32>
    %75 = arith.mulf %69, %74 : vector<8x32xf32>
    %76 = arith.addf %73, %75 : vector<8x32xf32>
    %c0_29 = arith.constant 0 : index
    %c64 = arith.constant 64 : index
    %77 = vector.load %arg12[%c0_29, %c64] : memref<8x256xf32, #tpu.memory_space<vmem>>, vector<8x32xf32>
    tpu.vector_store %arg12[%c0_29, %c64], %76 {strides = array<i32>} : memref<8x256xf32, #tpu.memory_space<vmem>>, vector<8x32xf32>,
    %cst_30 = arith.constant dense<0.000000e+00> : vector<8x64xf32>
    %78 = tpu.matmul %76, %11, %cst_30 {dimension_numbers = #tpu.dot_dimension_numbers<[1], [0], [0], [1], [0, 0, 1, 1], [], []>} : vector<8x32xf32>, vector<32x64xf32>, vector<8x64xf32> -> vector<8x64xf32>
    %cst_31 = arith.constant dense<0.000000e+00> : vector<8x32xf32>
    %79 = tpu.matmul %76, %12, %cst_31 {dimension_numbers = #tpu.dot_dimension_numbers<[1], [0], [0], [1], [0, 0, 1, 1], [], []>} : vector<8x32xf32>, vector<32x32xf32>, vector<8x32xf32> -> vector<8x32xf32>
    %80 = vector.broadcast %13 : vector<1x32xf32> to vector<8x32xf32>
    %81 = arith.addf %79, %80 : vector<8x32xf32>
    %82 = vector.extract_strided_slice %5 {offsets = [24, 0], sizes = [8, 64], strides = [1, 1]} : vector<64x64xf32> to vector<8x64xf32>
    %83 = arith.addf %82, %78 : vector<8x64xf32>
    %84 = arith.negf %83 : vector<8x64xf32>
    %85 = math.exp %84 : vector<8x64xf32>
    %cst_32 = arith.constant 1.000000e+00 : f32
    %86 = vector.broadcast %cst_32 : f32 to vector<8x64xf32>
    %87 = arith.addf %86, %85 : vector<8x64xf32>
    %88 = arith.divf %86, %87 : vector<8x64xf32>
    %89 = vector.extract_strided_slice %88 {offsets = [0, 0], sizes = [8, 32], strides = [1, 1]} : vector<8x64xf32> to vector<8x32xf32>
    %90 = vector.extract_strided_slice %88 {offsets = [0, 32], sizes = [8, 32], strides = [1, 1]} : vector<8x64xf32> to vector<8x32xf32>
    %91 = vector.extract_strided_slice %10 {offsets = [24, 0], sizes = [8, 32], strides = [1, 1]} : vector<64x32xf32> to vector<8x32xf32>
    %92 = arith.mulf %89, %81 : vector<8x32xf32>
    %93 = arith.addf %91, %92 : vector<8x32xf32>
    %94 = math.tanh %93 : vector<8x32xf32>
    %95 = arith.subf %76, %94 : vector<8x32xf32>
    %96 = arith.mulf %90, %95 : vector<8x32xf32>
    %97 = arith.addf %94, %96 : vector<8x32xf32>
    %c0_33 = arith.constant 0 : index
    %c96 = arith.constant 96 : index
    %98 = vector.load %arg12[%c0_33, %c96] : memref<8x256xf32, #tpu.memory_space<vmem>>, vector<8x32xf32>
    tpu.vector_store %arg12[%c0_33, %c96], %97 {strides = array<i32>} : memref<8x256xf32, #tpu.memory_space<vmem>>, vector<8x32xf32>,
    %cst_34 = arith.constant dense<0.000000e+00> : vector<8x64xf32>
    %99 = tpu.matmul %97, %11, %cst_34 {dimension_numbers = #tpu.dot_dimension_numbers<[1], [0], [0], [1], [0, 0, 1, 1], [], []>} : vector<8x32xf32>, vector<32x64xf32>, vector<8x64xf32> -> vector<8x64xf32>
    %cst_35 = arith.constant dense<0.000000e+00> : vector<8x32xf32>
    %100 = tpu.matmul %97, %12, %cst_35 {dimension_numbers = #tpu.dot_dimension_numbers<[1], [0], [0], [1], [0, 0, 1, 1], [], []>} : vector<8x32xf32>, vector<32x32xf32>, vector<8x32xf32> -> vector<8x32xf32>
    %101 = vector.broadcast %13 : vector<1x32xf32> to vector<8x32xf32>
    %102 = arith.addf %100, %101 : vector<8x32xf32>
    %103 = vector.extract_strided_slice %5 {offsets = [32, 0], sizes = [8, 64], strides = [1, 1]} : vector<64x64xf32> to vector<8x64xf32>
    %104 = arith.addf %103, %99 : vector<8x64xf32>
    %105 = arith.negf %104 : vector<8x64xf32>
    %106 = math.exp %105 : vector<8x64xf32>
    %cst_36 = arith.constant 1.000000e+00 : f32
    %107 = vector.broadcast %cst_36 : f32 to vector<8x64xf32>
    %108 = arith.addf %107, %106 : vector<8x64xf32>
    %109 = arith.divf %107, %108 : vector<8x64xf32>
    %110 = vector.extract_strided_slice %109 {offsets = [0, 0], sizes = [8, 32], strides = [1, 1]} : vector<8x64xf32> to vector<8x32xf32>
    %111 = vector.extract_strided_slice %109 {offsets = [0, 32], sizes = [8, 32], strides = [1, 1]} : vector<8x64xf32> to vector<8x32xf32>
    %112 = vector.extract_strided_slice %10 {offsets = [32, 0], sizes = [8, 32], strides = [1, 1]} : vector<64x32xf32> to vector<8x32xf32>
    %113 = arith.mulf %110, %102 : vector<8x32xf32>
    %114 = arith.addf %112, %113 : vector<8x32xf32>
    %115 = math.tanh %114 : vector<8x32xf32>
    %116 = arith.subf %97, %115 : vector<8x32xf32>
    %117 = arith.mulf %111, %116 : vector<8x32xf32>
    %118 = arith.addf %115, %117 : vector<8x32xf32>
    %c0_37 = arith.constant 0 : index
    %c128 = arith.constant 128 : index
    %119 = vector.load %arg12[%c0_37, %c128] : memref<8x256xf32, #tpu.memory_space<vmem>>, vector<8x32xf32>
    tpu.vector_store %arg12[%c0_37, %c128], %118 {strides = array<i32>} : memref<8x256xf32, #tpu.memory_space<vmem>>, vector<8x32xf32>,
    %cst_38 = arith.constant dense<0.000000e+00> : vector<8x64xf32>
    %120 = tpu.matmul %118, %11, %cst_38 {dimension_numbers = #tpu.dot_dimension_numbers<[1], [0], [0], [1], [0, 0, 1, 1], [], []>} : vector<8x32xf32>, vector<32x64xf32>, vector<8x64xf32> -> vector<8x64xf32>
    %cst_39 = arith.constant dense<0.000000e+00> : vector<8x32xf32>
    %121 = tpu.matmul %118, %12, %cst_39 {dimension_numbers = #tpu.dot_dimension_numbers<[1], [0], [0], [1], [0, 0, 1, 1], [], []>} : vector<8x32xf32>, vector<32x32xf32>, vector<8x32xf32> -> vector<8x32xf32>
    %122 = vector.broadcast %13 : vector<1x32xf32> to vector<8x32xf32>
    %123 = arith.addf %121, %122 : vector<8x32xf32>
    %124 = vector.extract_strided_slice %5 {offsets = [40, 0], sizes = [8, 64], strides = [1, 1]} : vector<64x64xf32> to vector<8x64xf32>
    %125 = arith.addf %124, %120 : vector<8x64xf32>
    %126 = arith.negf %125 : vector<8x64xf32>
    %127 = math.exp %126 : vector<8x64xf32>
    %cst_40 = arith.constant 1.000000e+00 : f32
    %128 = vector.broadcast %cst_40 : f32 to vector<8x64xf32>
    %129 = arith.addf %128, %127 : vector<8x64xf32>
    %130 = arith.divf %128, %129 : vector<8x64xf32>
    %131 = vector.extract_strided_slice %130 {offsets = [0, 0], sizes = [8, 32], strides = [1, 1]} : vector<8x64xf32> to vector<8x32xf32>
    %132 = vector.extract_strided_slice %130 {offsets = [0, 32], sizes = [8, 32], strides = [1, 1]} : vector<8x64xf32> to vector<8x32xf32>
    %133 = vector.extract_strided_slice %10 {offsets = [40, 0], sizes = [8, 32], strides = [1, 1]} : vector<64x32xf32> to vector<8x32xf32>
    %134 = arith.mulf %131, %123 : vector<8x32xf32>
    %135 = arith.addf %133, %134 : vector<8x32xf32>
    %136 = math.tanh %135 : vector<8x32xf32>
    %137 = arith.subf %118, %136 : vector<8x32xf32>
    %138 = arith.mulf %132, %137 : vector<8x32xf32>
    %139 = arith.addf %136, %138 : vector<8x32xf32>
    %c0_41 = arith.constant 0 : index
    %c160 = arith.constant 160 : index
    %140 = vector.load %arg12[%c0_41, %c160] : memref<8x256xf32, #tpu.memory_space<vmem>>, vector<8x32xf32>
    tpu.vector_store %arg12[%c0_41, %c160], %139 {strides = array<i32>} : memref<8x256xf32, #tpu.memory_space<vmem>>, vector<8x32xf32>,
    %cst_42 = arith.constant dense<0.000000e+00> : vector<8x64xf32>
    %141 = tpu.matmul %139, %11, %cst_42 {dimension_numbers = #tpu.dot_dimension_numbers<[1], [0], [0], [1], [0, 0, 1, 1], [], []>} : vector<8x32xf32>, vector<32x64xf32>, vector<8x64xf32> -> vector<8x64xf32>
    %cst_43 = arith.constant dense<0.000000e+00> : vector<8x32xf32>
    %142 = tpu.matmul %139, %12, %cst_43 {dimension_numbers = #tpu.dot_dimension_numbers<[1], [0], [0], [1], [0, 0, 1, 1], [], []>} : vector<8x32xf32>, vector<32x32xf32>, vector<8x32xf32> -> vector<8x32xf32>
    %143 = vector.broadcast %13 : vector<1x32xf32> to vector<8x32xf32>
    %144 = arith.addf %142, %143 : vector<8x32xf32>
    %145 = vector.extract_strided_slice %5 {offsets = [48, 0], sizes = [8, 64], strides = [1, 1]} : vector<64x64xf32> to vector<8x64xf32>
    %146 = arith.addf %145, %141 : vector<8x64xf32>
    %147 = arith.negf %146 : vector<8x64xf32>
    %148 = math.exp %147 : vector<8x64xf32>
    %cst_44 = arith.constant 1.000000e+00 : f32
    %149 = vector.broadcast %cst_44 : f32 to vector<8x64xf32>
    %150 = arith.addf %149, %148 : vector<8x64xf32>
    %151 = arith.divf %149, %150 : vector<8x64xf32>
    %152 = vector.extract_strided_slice %151 {offsets = [0, 0], sizes = [8, 32], strides = [1, 1]} : vector<8x64xf32> to vector<8x32xf32>
    %153 = vector.extract_strided_slice %151 {offsets = [0, 32], sizes = [8, 32], strides = [1, 1]} : vector<8x64xf32> to vector<8x32xf32>
    %154 = vector.extract_strided_slice %10 {offsets = [48, 0], sizes = [8, 32], strides = [1, 1]} : vector<64x32xf32> to vector<8x32xf32>
    %155 = arith.mulf %152, %144 : vector<8x32xf32>
    %156 = arith.addf %154, %155 : vector<8x32xf32>
    %157 = math.tanh %156 : vector<8x32xf32>
    %158 = arith.subf %139, %157 : vector<8x32xf32>
    %159 = arith.mulf %153, %158 : vector<8x32xf32>
    %160 = arith.addf %157, %159 : vector<8x32xf32>
    %c0_45 = arith.constant 0 : index
    %c192 = arith.constant 192 : index
    %161 = vector.load %arg12[%c0_45, %c192] : memref<8x256xf32, #tpu.memory_space<vmem>>, vector<8x32xf32>
    tpu.vector_store %arg12[%c0_45, %c192], %160 {strides = array<i32>} : memref<8x256xf32, #tpu.memory_space<vmem>>, vector<8x32xf32>,
    %cst_46 = arith.constant dense<0.000000e+00> : vector<8x64xf32>
    %162 = tpu.matmul %160, %11, %cst_46 {dimension_numbers = #tpu.dot_dimension_numbers<[1], [0], [0], [1], [0, 0, 1, 1], [], []>} : vector<8x32xf32>, vector<32x64xf32>, vector<8x64xf32> -> vector<8x64xf32>
    %cst_47 = arith.constant dense<0.000000e+00> : vector<8x32xf32>
    %163 = tpu.matmul %160, %12, %cst_47 {dimension_numbers = #tpu.dot_dimension_numbers<[1], [0], [0], [1], [0, 0, 1, 1], [], []>} : vector<8x32xf32>, vector<32x32xf32>, vector<8x32xf32> -> vector<8x32xf32>
    %164 = vector.broadcast %13 : vector<1x32xf32> to vector<8x32xf32>
    %165 = arith.addf %163, %164 : vector<8x32xf32>
    %166 = vector.extract_strided_slice %5 {offsets = [56, 0], sizes = [8, 64], strides = [1, 1]} : vector<64x64xf32> to vector<8x64xf32>
    %167 = arith.addf %166, %162 : vector<8x64xf32>
    %168 = arith.negf %167 : vector<8x64xf32>
    %169 = math.exp %168 : vector<8x64xf32>
    %cst_48 = arith.constant 1.000000e+00 : f32
    %170 = vector.broadcast %cst_48 : f32 to vector<8x64xf32>
    %171 = arith.addf %170, %169 : vector<8x64xf32>
    %172 = arith.divf %170, %171 : vector<8x64xf32>
    %173 = vector.extract_strided_slice %172 {offsets = [0, 0], sizes = [8, 32], strides = [1, 1]} : vector<8x64xf32> to vector<8x32xf32>
    %174 = vector.extract_strided_slice %172 {offsets = [0, 32], sizes = [8, 32], strides = [1, 1]} : vector<8x64xf32> to vector<8x32xf32>
    %175 = vector.extract_strided_slice %10 {offsets = [56, 0], sizes = [8, 32], strides = [1, 1]} : vector<64x32xf32> to vector<8x32xf32>
    %176 = arith.mulf %173, %165 : vector<8x32xf32>
    %177 = arith.addf %175, %176 : vector<8x32xf32>
    %178 = math.tanh %177 : vector<8x32xf32>
    %179 = arith.subf %160, %178 : vector<8x32xf32>
    %180 = arith.mulf %174, %179 : vector<8x32xf32>
    %181 = arith.addf %178, %180 : vector<8x32xf32>
    %c0_49 = arith.constant 0 : index
    %c224 = arith.constant 224 : index
    %182 = vector.load %arg12[%c0_49, %c224] : memref<8x256xf32, #tpu.memory_space<vmem>>, vector<8x32xf32>
    tpu.vector_store %arg12[%c0_49, %c224], %181 {strides = array<i32>} : memref<8x256xf32, #tpu.memory_space<vmem>>, vector<8x32xf32>,
    %c0_50 = arith.constant 0 : index
    %c0_51 = arith.constant 0 : index
    %183 = vector.load %arg8[%c0_50, %c0_51] : memref<32x64xf32, #tpu.memory_space<vmem>>, vector<32x64xf32>
    %cst_52 = arith.constant dense<0.000000e+00> : vector<8x64xf32>
    %184 = tpu.matmul %181, %183, %cst_52 {dimension_numbers = #tpu.dot_dimension_numbers<[1], [0], [0], [1], [0, 0, 1, 1], [], []>} : vector<8x32xf32>, vector<32x64xf32>, vector<8x64xf32> -> vector<8x64xf32>
    %c0_53 = arith.constant 0 : index
    %c0_54 = arith.constant 0 : index
    %185 = vector.load %arg9[%c0_53, %c0_54] : memref<1x64xf32, #tpu.memory_space<vmem>>, vector<1x64xf32>
    %186 = vector.broadcast %185 : vector<1x64xf32> to vector<8x64xf32>
    %187 = arith.addf %184, %186 : vector<8x64xf32>
    %cst_55 = arith.constant 0.000000e+00 : f32
    %188 = vector.broadcast %cst_55 : f32 to vector<8x64xf32>
    %189 = arith.maximumf %187, %188 : vector<8x64xf32>
    %c0_56 = arith.constant 0 : index
    %c0_57 = arith.constant 0 : index
    %190 = vector.load %arg10[%c0_56, %c0_57] : memref<64x8xf32, #tpu.memory_space<vmem>>, vector<64x8xf32>
    %cst_58 = arith.constant dense<0.000000e+00> : vector<8x8xf32>
    %191 = tpu.matmul %189, %190, %cst_58 {dimension_numbers = #tpu.dot_dimension_numbers<[1], [0], [0], [1], [0, 0, 1, 1], [], []>} : vector<8x64xf32>, vector<64x8xf32>, vector<8x8xf32> -> vector<8x8xf32>
    %c0_59 = arith.constant 0 : index
    %c0_60 = arith.constant 0 : index
    %192 = vector.load %arg11[%c0_59, %c0_60] : memref<1x8xf32, #tpu.memory_space<vmem>>, vector<1x8xf32>
    %193 = vector.broadcast %192 : vector<1x8xf32> to vector<8x8xf32>
    %194 = arith.addf %191, %193 : vector<8x8xf32>
    %cst_61 = arith.constant dense<0xFF800000> : vector<8xf32>
    %195 = vector.multi_reduction <maximumf>, %194, %cst_61 [1] : vector<8x8xf32> to vector<8xf32>
    %196 = vector.shape_cast %195 : vector<8xf32> to vector<8x1xf32>
    %197 = vector.broadcast %196 : vector<8x1xf32> to vector<8x8xf32>
    %198 = arith.subf %194, %197 : vector<8x8xf32>
    %199 = math.exp %198 : vector<8x8xf32>
    %cst_62 = arith.constant dense<0.000000e+00> : vector<8xf32>
    %200 = vector.multi_reduction <add>, %199, %cst_62 [1] : vector<8x8xf32> to vector<8xf32>
    %201 = vector.shape_cast %200 : vector<8xf32> to vector<8x1xf32>
    %202 = math.log %201 : vector<8x1xf32>
    %203 = arith.addf %202, %196 : vector<8x1xf32>
    %204 = vector.broadcast %203 : vector<8x1xf32> to vector<8x8xf32>
    %205 = arith.subf %194, %204 : vector<8x8xf32>
    %c0_63 = arith.constant 0 : index
    %c0_64 = arith.constant 0 : index
    %206 = vector.load %arg13[%c0_63, %c0_64] : memref<8x8xf32, #tpu.memory_space<vmem>>, vector<8x8xf32>
    tpu.vector_store %arg13[%c0_63, %c0_64], %205 {strides = array<i32>} : memref<8x8xf32, #tpu.memory_space<vmem>>, vector<8x8xf32>,
    return
  }
}

</mosaic_0001>

<bundles_post_ra>
// kernel: gru_forward.1
= control target key start
LH: loop header
LB: loop body
LE: loop exit
PB: predicated region body
PF: predicated region fallthrough
CT: control target
= control target key end

     0   :  { %vm61_vm0 = vcmask 130048   ;;  %v2471_v10 = vmov 0.0|0.0   ;;  %s2949_s0 = inlined_call_operand.vmem [shape: f32[64,16], index: 0, kind: input, shape index: {}]   ;;  %s2950_s1 = inlined_call_operand.vmem [shape: f32[16,64], index: 1, kind: input, shape index: {}]   ;;  %s2951_s2 = inlined_call_operand.vmem [shape: f32[16,32], index: 2, kind: input, shape index: {}]   ;;  %s2952_s3 = inlined_call_operand.vmem [shape: f32[1,64], index: 3, kind: input, shape index: {}]   ;;  %s2953_s4 = inlined_call_operand.vmem [shape: f32[1,32], index: 4, kind: input, shape index: {}]   ;;  %s2954_s5 = inlined_call_operand.vmem [shape: f32[32,64], index: 5, kind: input, shape index: {}]   ;;  %s2955_s6 = inlined_call_operand.vmem [shape: f32[32,32], index: 6, kind: input, shape index: {}]   ;;  %s2956_s7 = inlined_call_operand.vmem [shape: f32[1,32], index: 7, kind: input, shape index: {}]   ;;  %s2957_s8 = inlined_call_operand.vmem [shape: f32[32,64], index: 8, kind: input, shape index: {}]   ;;  %s2958_s9 = inlined_call_operand.vmem [shape: f32[1,64], index: 9, kind: input, shape index: {}]   ;;  %s2959_s10 = inlined_call_operand.vmem [shape: f32[64,8], index: 10, kind: input, shape index: {}]   ;;  %s2960_s11 = inlined_call_operand.vmem [shape: f32[1,8], index: 11, kind: input, shape index: {}]   ;;  %s2961_s12 = inlined_call_operand.vmem [shape: f32[8,256], index: 12, kind: output, shape index: {0}]   ;;  %s2962_s13 = inlined_call_operand.hbm [shape: f32[8,8], index: 13, kind: output, shape index: {1}]  }
   0x1   :  { %v52_v0 = vld [vmem:[%s2950_s1] sm:$0xff]  ;;  %v53_v1 = vld [vmem:[%s2950_s1 + $0x8] sm:$0xff]  ;;  %v46_v8 = vld [vmem:[%s2949_s0 + $0x10] sm:$0xff] }
   0x2   :  { %v44_v2 = vld [vmem:[%s2949_s0] sm:$0xff]  ;;  %v2266_v3 = vpack.c.bf16 %v53_v1, %v52_v0  ;;  %v306_v5 = vld [vmem:[%s2954_s5 + $0x8] sm:$0xff]  ;;  %v307_v11 = vld [vmem:[%s2954_s5 + $0x10] sm:$0xff] }
   0x3   :  { %2032 = vmatprep.mubr.msk.f32.mxu0 %vm61_vm0, %v44_v2  ;;  %v305_v4 = vld [vmem:[%s2954_s5] sm:$0xff]  ;;  %2048 = vmatprep.mubr.msk.f32.mxu1 %vm61_vm0, %v44_v2  ;;  %v45_v6 = vld [vmem:[%s2949_s0 + $0x8] sm:$0xff]  ;;  %v308_v12 = vld [vmem:[%s2954_s5 + $0x18] sm:$0xff] }
   0x4   :  { %2267 = vmatprep.subr.bf16.mxu0 %v2266_v3  ;;  %v2568_v7 = vpack.c.bf16 %v306_v5, %v305_v4  ;;  %v191_v9 = vld [vmem:[%s2951_s2] sm:$0xff]  ;;  %v192_v13 = vld [vmem:[%s2951_s2 + $0x8] sm:$0xff] }
   0x5   :  { %2269 = vmatpush3.bf16.msra.mxu0 %v2266_v3  ;;  %v2270_v14 = vpack.c.bf16 %v192_v13, %v191_v9 }
   0x6   :  { %2274 = vmatprep.subr.bf16.mxu0 %v2471_v10 }
   0x7   :  { %19 = vsyncpa [#allocation3], 0  ;;  %v309_v15 = vld [vmem:[%s2955_s6] sm:$0xff]  ;;  %v310_v16 = vld [vmem:[%s2955_s6 + $0x8] sm:$0xff]  ;;  %v2598_v18 = vpack.c.bf16 %v308_v12, %v307_v11  ;;  %2271 = vmatprep.subr.bf16.mxu1 %v2270_v14  ;;  %vm2472_vm1 = vmmov 0   ;;  %v2473_v27 = vmov 0.0  }
   0x8   :  { %2033 = vmatmul.mubr.msk.f32.vlgmr.msra.gmra.mrb[0].mxu0 %vm61_vm0, %v45_v6  ;;  %v47_v17 = vld [vmem:[%s2949_s0 + $0x18] sm:$0xff]  ;;  %v48_v19 = vld [vmem:[%s2949_s0 + $0x20] sm:$0xff]  ;;  %2273 = vmatpush3.bf16.msra.mxu1 %v2270_v14  ;;  %v2604_v20 = vpack.c.bf16 %v310_v16, %v309_v15  ;;  %v311_v21 = vld [vmem:[%s2955_s6 + $0x10] sm:$0xff]  ;;  %s2474_s29 = smov 32   ;;  %s2475_s30 = smov 96   ;;  %vm314_vm2 = vcmask 261120  }
   0x9   :  { %2276 = vmatpush3.bf16.msra.mxu0 %v2568_v7  ;;  %2035 = vmatprep.mubr.msk.f32.mxu0 %vm61_vm0, %v46_v8  ;;  %v312_v22 = vld [vmem:[%s2955_s6 + $0x18] sm:$0xff]  ;;  %v49_v23 = vld [vmem:[%s2949_s0 + $0x28] sm:$0xff]  ;;  %v50_v24 = vld [vmem:[%s2949_s0 + $0x30] sm:$0xff]  ;;  %vm654_vm3 = vcmask 523520   ;;  %vm823_vm4 = vcmask 785920   ;;  %vm1762_vm5 = vcmask 523264  }
   0xa   :  { %2277 = vmatprep.subr.bf16.mxu0 %v2471_v10  ;;  %2280 = vmatprep.subr.bf16.mxu1 %v2471_v10  ;;  %v2626_v25 = vpack.c.bf16 %v312_v22, %v311_v21  ;;  %v51_v26 = vld [vmem:[%s2949_s0 + $0x38] sm:$0xff]  ;;  %v1869_v28 = vld [vmem:[%s2952_s3] ss:$0 sm:$0xff]  ;;  %vm1836_vm6 = vcmask 64512   ;;  %vm992_vm7 = vcmask 1048320   ;;  %s2477_s0 = smov [#allocation2]  }
   0xb   :  { %2049 = vmatmul.mubr.msk.f32.vlgmr.msra.gmra.mrb[0].mxu1 %vm61_vm0, %v45_v6  ;;  %v1878_v33 = vld [vmem:[%s2953_s4] ss:$0 sm:$0xff] }
   0xc   :  { %2036 = vmatmul.mubr.msk.f32.gmra.mrb[2].mxu0 %vm61_vm0, %v47_v17  ;;  %2282 = vmatpush3.bf16.msra.mxu1 %v2604_v20  ;;  %v2697_v5 = vld [vmem:[%s2956_s7] ss:$0 sm:$0xff]  ;;  %s2476_s7 = smov 64  }
   0xd   :  { %2038 = vmatprep.mubr.msk.f32.mxu0 %vm61_vm0, %v48_v19  ;;  %2279 = vmatpush3.bf16.msra.mxu0 %v2598_v18 }
   0xe   :  { %2286 = vmatprep.subr.bf16.mxu0 %v2471_v10  ;;  %2051 = vmatprep.mubr.msk.f32.mxu1 %vm61_vm0, %v46_v8 }
   0xf   :  { %2283 = vmatprep.subr.bf16.mxu1 %v2471_v10  ;;  %2052 = vmatmul.mubr.msk.f32.gmra.mrb[2].mxu1 %vm61_vm0, %v47_v17 }
  0x10   :  { %2039 = vmatmul.mubr.msk.f32.gmra.mrb[4].mxu0 %vm61_vm0, %v49_v23  ;;  %2054 = vmatprep.mubr.msk.f32.mxu1 %vm61_vm0, %v48_v19 }
  0x11   :  { %2041 = vmatprep.mubr.msk.f32.mxu0 %vm61_vm0, %v50_v24  ;;  %2285 = vmatpush3.bf16.msra.mxu1 %v2626_v25 }
  0x12   :  { %2292 = vmatprep.subr.bf16.mxu1 %v2471_v10 }
  0x13   :  { %2055 = vmatmul.mubr.msk.f32.gmra.mrb[4].mxu1 %vm61_vm0, %v49_v23 }
  0x14   :  { %2042 = vmatmul.mubr.msk.f32.gmra.mrb[6].mxu0 %vm61_vm0, %v51_v26  ;;  %2057 = vmatprep.mubr.msk.f32.mxu1 %vm61_vm0, %v50_v24 }
  0x15   :  { %2068 = vmatprep.mubr.msk.f32.mxu0 %vm2472_vm1, %v2473_v27 }
  0x17   :  { %2058 = vmatmul.mubr.msk.f32.gmra.mrb[6].mxu1 %vm61_vm0, %v51_v26 }
  0x18   :  { %2069 = vmatmul.mubr.f32.vlgmr.msra.gmra.mrb[8].mxu0 %v2473_v27  ;;  %2079 = vmatprep.mubr.msk.f32.mxu1 %vm2472_vm1, %v2473_v27 }
  0x19   :  { %2288 = vmatpush3.bf16.msra.mxu0 %v2568_v7  ;;  %2090 = vmatprep.mubr.msk.f32.mxu0 %vm2472_vm1, %v2473_v27 }
  0x1a   :  { %2289 = vmatprep.subr.bf16.mxu0 %v2471_v10 }
  0x1b   :  { %2080 = vmatmul.mubr.f32.vlgmr.msra.gmra.mrb[8].mxu1 %v2473_v27 }
  0x1c   :  { %2294 = vmatpush3.bf16.msra.mxu1 %v2604_v20  ;;  %2101 = vmatprep.mubr.msk.f32.mxu1 %vm2472_vm1, %v2473_v27 }
  0x1d   :  { %2291 = vmatpush3.bf16.msra.mxu0 %v2598_v18  ;;  %2295 = vmatprep.subr.bf16.mxu1 %v2471_v10 }
  0x1e   :  { %2298 = vmatprep.subr.bf16.mxu0 %v2471_v10 }
  0x20   :  { %2297 = vmatpush3.bf16.msra.mxu1 %v2626_v25 }
  0x21   :  { %2304 = vmatprep.subr.bf16.mxu1 %v2471_v10 }
  0xdb   :  { %v2034_v29 = vpop.f32.mrb[0].mxu0 }
  0xdc   :  { %v2663_v30 = vadd.f32 %v2034_v29, %v1869_v28  ;;  %v152_v31 = vpop.f32.mrb[1].mxu0 }
  0xdd   :  { %v153_v53 = vadd.f32 %v1869_v28, %v152_v31 }
  0xde   :  { %v2050_v37 = vpop.f32.mrb[0].mxu1 }
  0xdf   :  { %v2037_v32 = vpop.f32.mrb[2].mxu0  ;;  %v2672_v38 = vadd.f32 %v2050_v37, %v1878_v33  ;;  %v266_v39 = vpop.f32.mrb[1].mxu1 }
  0xe0   :  { %v2668_v34 = vadd.f32 %v2037_v32, %v1869_v28  ;;  %v162_v35 = vpop.f32.mrb[3].mxu0  ;;  %v267_v9 = vadd.f32 %v1878_v33, %v266_v39 }
  0xe1   :  { %v2670_v36 = vadd.f32 %v1869_v28, %v162_v35 }
  0xe2   :  { %v2053_v44 = vpop.f32.mrb[2].mxu1 }
  0xe3   :  { %v2040_v40 = vpop.f32.mrb[4].mxu0  ;;  %v2678_v45 = vadd.f32 %v2053_v44, %v1878_v33  ;;  %v276_v46 = vpop.f32.mrb[3].mxu1 }
  0xe4   :  { %v2674_v41 = vadd.f32 %v2040_v40, %v1869_v28  ;;  %v172_v42 = vpop.f32.mrb[5].mxu0  ;;  %v2680_v48 = vadd.f32 %v1878_v33, %v276_v46 }
  0xe5   :  { %v2676_v43 = vadd.f32 %v1869_v28, %v172_v42 }
  0xe6   :  { %v2056_v52 = vpop.f32.mrb[4].mxu1 }
  0xe7   :  { %v2043_v47 = vpop.f32.mrb[6].mxu0  ;;  %v2686_v54 = vadd.f32 %v2056_v52, %v1878_v33  ;;  %v286_v55 = vpop.f32.mrb[5].mxu1 }
  0xe8   :  { %v2682_v49 = vadd.f32 %v2043_v47, %v1869_v28  ;;  %v182_v50 = vpop.f32.mrb[7].mxu0  ;;  %v2688_v57 = vadd.f32 %v1878_v33, %v286_v55 }
  0xe9   :  { %v2684_v51 = vadd.f32 %v1869_v28, %v182_v50 }
  0xea   :  { %v2059_v60 = vpop.f32.mrb[6].mxu1 }
  0xeb   :  { %v384_v56 = vpop.f32.mrb[8].mxu0  ;;  %v2690_v62 = vadd.f32 %v2059_v60, %v1878_v33  ;;  %v296_v63 = vpop.f32.mrb[7].mxu1 }
  0xec   :  { %v464_v58 = vadd.f32 %v384_v56, %v153_v53  ;;  %v2070_v59 = vpop.f32.mrb[9].mxu0  ;;  %v2692_v0 = vadd.f32 %v1878_v33, %v296_v63 }
  0xee   :  { %v1888_v61 = vmul.f32 -1.442695, %v464_v58  ;;  %v460_v1 = vpop.f32.mrb[8].mxu1 }
  0xef   :  { %v2081_v2 = vpop.f32.mrb[9].mxu1  ;;  %v461_v6 = vadd.f32 %v2697_v5, %v460_v1 }
  0xf0   :  { %2395 = vpow2.f32 %v1888_v61 }
  0xfa   :  { %v2396_v3 = vpop.eup %2395 }
  0xfb   :  { %v468_v4 = vadd.f32 1.0, %v2396_v3 }
  0xfd   :  { %2397 = vrcp.f32 %v468_v4 }
 0x107   :  { %v2398_v8 = vpop.eup %2397 }
 0x108   :  { %v471_v11 = vmul.f32 %v2398_v8, %v461_v6 }
 0x10a   :  { %v472_v12 = vadd.f32 %v471_v11, %v267_v9 }
 0x10c   :  { %2399 = vtanh.f32 %v472_v12 }
 0x116   :  { %v2400_v13 = vpop.eup %2399 }
 0x117   :  { %v474_v14 = vsub.f32 0.0, %v2400_v13 }
 0x119   :  { %476 = vrot.lane.b32.xlu0 %v474_v14, %s2474_s29 }
 0x18b   :  { %v477_v15 = vpop.permute.xlu0 %476 }
 0x18c   :  { %v479_v16 = vmul.f32 %v2398_v8, %v477_v15 }
 0x18e   :  { %481 = vrot.lane.b32.xlu0 %v479_v16, %s2475_s30 }
 0x200   :  { %v482_v17 = vpop.permute.xlu0 %481 }
 0x201   :  { %v484_v19 = vadd.f32 %v2400_v13, %v482_v17 }
 0x203   :  { %2091 = vmatmul.mubr.msk.f32.vlgmr.msra.gmra.mrb[10].mxu0 %vm314_vm2, %v484_v19  ;;  %485 = vst.msk [vmem:[%s2961_s12] sm:$0xff] %vm314_vm2, %v484_v19  ;;  %2102 = vmatmul.mubr.msk.f32.vlgmr.msra.gmra.mrb[10].mxu1 %vm314_vm2, %v484_v19 }
 0x204   :  { %2300 = vmatpush3.bf16.msra.mxu0 %v2568_v7  ;;  %2306 = vmatpush3.bf16.msra.mxu1 %v2604_v20 }
 0x205   :  { %2301 = vmatprep.subr.bf16.mxu0 %v2471_v10  ;;  %2307 = vmatprep.subr.bf16.mxu1 %v2471_v10 }
 0x206   :  { %2112 = vmatprep.mubr.msk.f32.mxu0 %vm2472_vm1, %v2473_v27  ;;  %2123 = vmatprep.mubr.msk.f32.mxu1 %vm2472_vm1, %v2473_v27 }
 0x208   :  { %2303 = vmatpush3.bf16.msra.mxu0 %v2598_v18  ;;  %2309 = vmatpush3.bf16.msra.mxu1 %v2626_v25 }
 0x209   :  { %2310 = vmatprep.subr.bf16.mxu0 %v2471_v10  ;;  %2316 = vmatprep.subr.bf16.mxu1 %v2471_v10 }
 0x2d6   :  { %v555_v21 = vpop.f32.mrb[10].mxu0  ;;  %v625_v22 = vpop.f32.mrb[10].mxu1 }
 0x2d7   :  { %v629_v23 = vadd.f32 %v555_v21, %v2663_v30  ;;  %v2092_v24 = vpop.f32.mrb[11].mxu0  ;;  %v2103_v26 = vpop.f32.mrb[11].mxu1  ;;  %v626_v32 = vadd.f32 %v2697_v5, %v625_v22 }
 0x2d9   :  { %v1891_v28 = vmul.f32 -1.442695, %v629_v23 }
 0x2db   :  { %2401 = vpow2.f32 %v1891_v28 }
 0x2e5   :  { %v2402_v29 = vpop.eup %2401 }
 0x2e6   :  { %v633_v31 = vadd.f32 1.0, %v2402_v29 }
 0x2e8   :  { %2403 = vrcp.f32 %v633_v31 }
 0x2f2   :  { %v2404_v33 = vpop.eup %2403 }
 0x2f3   :  { %v636_v35 = vmul.f32 %v2404_v33, %v626_v32 }
 0x2f5   :  { %v637_v37 = vadd.f32 %v636_v35, %v2672_v38 }
 0x2f7   :  { %2405 = vtanh.f32 %v637_v37 }
 0x301   :  { %v2406_v39 = vpop.eup %2405 }
 0x302   :  { %v639_v40 = vsub.f32 %v484_v19, %v2406_v39 }
 0x304   :  { %641 = vrot.lane.b32.xlu1 %v639_v40, %s2474_s29 }
 0x376   :  { %v642_v42 = vpop.permute.xlu1 %641 }
 0x377   :  { %v644_v30 = vmul.f32 %v2404_v33, %v642_v42 }
 0x379   :  { %646 = vrot.lane.b32.xlu1 %v644_v30, %s2475_s30 }
 0x3eb   :  { %v647_v44 = vpop.permute.xlu1 %646 }
 0x3ec   :  { %v2725_v46 = vadd.f32 %v2406_v39, %v647_v44 }
 0x3ee   :  { %2113 = vmatmul.mubr.msk.f32.vlgmr.msra.gmra.mrb[12].mxu0 %vm314_vm2, %v2725_v46  ;;  %2124 = vmatmul.mubr.msk.f32.vlgmr.msra.gmra.mrb[12].mxu1 %vm314_vm2, %v2725_v46 }
 0x3ef   :  { %2312 = vmatpush3.bf16.msra.mxu0 %v2568_v7  ;;  %2318 = vmatpush3.bf16.msra.mxu1 %v2604_v20 }
 0x3f0   :  { %2313 = vmatprep.subr.bf16.mxu0 %v2471_v10  ;;  %2319 = vmatprep.subr.bf16.mxu1 %v2471_v10 }
 0x3f1   :  { %2134 = vmatprep.mubr.msk.f32.mxu0 %vm2472_vm1, %v2473_v27  ;;  %2145 = vmatprep.mubr.msk.f32.mxu1 %vm2472_vm1, %v2473_v27 }
 0x3f3   :  { %2315 = vmatpush3.bf16.msra.mxu0 %v2598_v18  ;;  %2321 = vmatpush3.bf16.msra.mxu1 %v2626_v25 }
 0x3f4   :  { %2322 = vmatprep.subr.bf16.mxu0 %v2471_v10  ;;  %2328 = vmatprep.subr.bf16.mxu1 %v2471_v10 }
 0x4c1   :  { %v724_v38 = vpop.f32.mrb[12].mxu0  ;;  %v794_v47 = vpop.f32.mrb[12].mxu1 }
 0x4c2   :  { %v798_v50 = vadd.f32 %v724_v38, %v2670_v36  ;;  %v2114_v52 = vpop.f32.mrb[13].mxu0  ;;  %v2125_v53 = vpop.f32.mrb[13].mxu1  ;;  %v795_v59 = vadd.f32 %v2697_v5, %v794_v47 }
 0x4c4   :  { %v1894_v55 = vmul.f32 -1.442695, %v798_v50 }
 0x4c6   :  { %2407 = vpow2.f32 %v1894_v55 }
 0x4d0   :  { %v2408_v56 = vpop.eup %2407 }
 0x4d1   :  { %v802_v58 = vadd.f32 1.0, %v2408_v56 }
 0x4d3   :  { %2409 = vrcp.f32 %v802_v58 }
 0x4dd   :  { %v2410_v60 = vpop.eup %2409 }
 0x4de   :  { %v805_v61 = vmul.f32 %v2410_v60, %v795_v59 }
 0x4e0   :  { %v806_v63 = vadd.f32 %v805_v61, %v2680_v48 }
 0x4e2   :  { %2411 = vtanh.f32 %v806_v63 }
 0x4ec   :  { %v2412_v1 = vpop.eup %2411 }
 0x4ed   :  { %v808_v2 = vsub.f32 %v2725_v46, %v2412_v1 }
 0x4ef   :  { %810 = vrot.lane.b32.xlu0 %v808_v2, %s2474_s29 }
 0x561   :  { %v811_v36 = vpop.permute.xlu0 %810 }
 0x562   :  { %v813_v3 = vmul.f32 %v2410_v60, %v811_v36 }
 0x564   :  { %815 = vrot.lane.b32.xlu1 %v813_v3, %s2475_s30 }
 0x5d6   :  { %v816_v4 = vpop.permute.xlu1 %815 }
 0x5d7   :  { %v2749_v6 = vadd.f32 %v2412_v1, %v816_v4 }
 0x5d9   :  { %2135 = vmatmul.mubr.msk.f32.vlgmr.msra.gmra.mrb[14].mxu0 %vm314_vm2, %v2749_v6  ;;  %2146 = vmatmul.mubr.msk.f32.vlgmr.msra.gmra.mrb[14].mxu1 %vm314_vm2, %v2749_v6 }
 0x5da   :  { %2324 = vmatpush3.bf16.msra.mxu0 %v2568_v7  ;;  %2330 = vmatpush3.bf16.msra.mxu1 %v2604_v20 }
 0x5db   :  { %2325 = vmatprep.subr.bf16.mxu0 %v2471_v10  ;;  %2331 = vmatprep.subr.bf16.mxu1 %v2471_v10 }
 0x5dc   :  { %2156 = vmatprep.mubr.msk.f32.mxu0 %vm2472_vm1, %v2473_v27  ;;  %2167 = vmatprep.mubr.msk.f32.mxu1 %vm2472_vm1, %v2473_v27 }
 0x5de   :  { %2327 = vmatpush3.bf16.msra.mxu0 %v2598_v18  ;;  %2333 = vmatpush3.bf16.msra.mxu1 %v2626_v25 }
 0x5df   :  { %2334 = vmatprep.subr.bf16.mxu0 %v2471_v10  ;;  %2340 = vmatprep.subr.bf16.mxu1 %v2471_v10 }
 0x6ac   :  { %v893_v48 = vpop.f32.mrb[14].mxu0  ;;  %v963_v8 = vpop.f32.mrb[14].mxu1 }
 0x6ad   :  { %v967_v9 = vadd.f32 %v893_v48, %v2668_v34  ;;  %v2136_v11 = vpop.f32.mrb[15].mxu0  ;;  %v2147_v12 = vpop.f32.mrb[15].mxu1  ;;  %v964_v16 = vadd.f32 %v2697_v5, %v963_v8 }
 0x6af   :  { %v1897_v13 = vmul.f32 -1.442695, %v967_v9 }
 0x6b1   :  { %2413 = vpow2.f32 %v1897_v13 }
 0x6bb   :  { %v2414_v14 = vpop.eup %2413 }
 0x6bc   :  { %v971_v15 = vadd.f32 1.0, %v2414_v14 }
 0x6be   :  { %2415 = vrcp.f32 %v971_v15 }
 0x6c8   :  { %v2416_v17 = vpop.eup %2415 }
 0x6c9   :  { %v974_v19 = vmul.f32 %v2416_v17, %v964_v16 }
 0x6cb   :  { %v975_v21 = vadd.f32 %v974_v19, %v2678_v45 }
 0x6cd   :  { %2417 = vtanh.f32 %v975_v21 }
 0x6d7   :  { %v2418_v22 = vpop.eup %2417 }
 0x6d8   :  { %v977_v23 = vsub.f32 %v2749_v6, %v2418_v22 }
 0x6da   :  { %979 = vrot.lane.b32.xlu0 %v977_v23, %s2474_s29 }
 0x74c   :  { %v980_v34 = vpop.permute.xlu0 %979 }
 0x74d   :  { %v982_v24 = vmul.f32 %v2416_v17, %v980_v34 }
 0x74f   :  { %984 = vrot.lane.b32.xlu1 %v982_v24, %s2475_s30 }
 0x7c1   :  { %v985_v26 = vpop.permute.xlu1 %984 }
 0x7c2   :  { %v2773_v28 = vadd.f32 %v2418_v22, %v985_v26 }
 0x7c4   :  { %2157 = vmatmul.mubr.msk.f32.vlgmr.msra.gmra.mrb[16].mxu0 %vm314_vm2, %v2773_v28  ;;  %2168 = vmatmul.mubr.msk.f32.vlgmr.msra.gmra.mrb[16].mxu1 %vm314_vm2, %v2773_v28 }
 0x7c5   :  { %2336 = vmatpush3.bf16.msra.mxu0 %v2568_v7  ;;  %2342 = vmatpush3.bf16.msra.mxu1 %v2604_v20 }
 0x7c6   :  { %2337 = vmatprep.subr.bf16.mxu0 %v2471_v10  ;;  %2343 = vmatprep.subr.bf16.mxu1 %v2471_v10 }
 0x7c7   :  { %2178 = vmatprep.mubr.msk.f32.mxu0 %vm2472_vm1, %v2473_v27  ;;  %2189 = vmatprep.mubr.msk.f32.mxu1 %vm2472_vm1, %v2473_v27 }
 0x7c9   :  { %2339 = vmatpush3.bf16.msra.mxu0 %v2598_v18  ;;  %2345 = vmatpush3.bf16.msra.mxu1 %v2626_v25 }
 0x7ca   :  { %2346 = vmatprep.subr.bf16.mxu0 %v2471_v10  ;;  %2352 = vmatprep.subr.bf16.mxu1 %v2471_v10 }
 0x897   :  { %v1062_v45 = vpop.f32.mrb[16].mxu0  ;;  %v1132_v29 = vpop.f32.mrb[16].mxu1 }
 0x898   :  { %v1136_v31 = vadd.f32 %v1062_v45, %v2676_v43  ;;  %v2158_v32 = vpop.f32.mrb[17].mxu0  ;;  %v2169_v33 = vpop.f32.mrb[17].mxu1  ;;  %v1133_v40 = vadd.f32 %v2697_v5, %v1132_v29 }
 0x89a   :  { %v1900_v35 = vmul.f32 -1.442695, %v1136_v31 }
 0x89c   :  { %2419 = vpow2.f32 %v1900_v35 }
 0x8a6   :  { %v2420_v37 = vpop.eup %2419 }
 0x8a7   :  { %v1140_v39 = vadd.f32 1.0, %v2420_v37 }
 0x8a9   :  { %2421 = vrcp.f32 %v1140_v39 }
 0x8b3   :  { %v2422_v42 = vpop.eup %2421 }
 0x8b4   :  { %v1143_v30 = vmul.f32 %v2422_v42, %v1133_v40 }
 0x8b6   :  { %v1144_v44 = vadd.f32 %v1143_v30, %v2688_v57 }
 0x8b8   :  { %2423 = vtanh.f32 %v1144_v44  ;;  %v1665_v44 = vld [vmem:[%s2957_s8 + $0x10] sm:$0xff] }
 0x8c2   :  { %v2424_v38 = vpop.eup %2423 }
 0x8c3   :  { %v1146_v47 = vsub.f32 %v2773_v28, %v2424_v38 }
 0x8c5   :  { %1148 = vrot.lane.b32.xlu0 %v1146_v47, %s2474_s29 }
 0x937   :  { %v1149_v43 = vpop.permute.xlu0 %1148 }
 0x938   :  { %v1151_v50 = vmul.f32 %v2422_v42, %v1149_v43  ;;  %v1747_v43 = vld [vmem:[%s2959_s10] sm:$0xff] }
 0x93a   :  { %1153 = vrot.lane.b32.xlu1 %v1151_v50, %s2475_s30  ;;  %v1748_v50 = vld [vmem:[%s2959_s10 + $0x8] sm:$0xff] }
 0x9ac   :  { %v1154_v52 = vpop.permute.xlu1 %1153 }
 0x9ad   :  { %v1156_v53 = vadd.f32 %v2424_v38, %v1154_v52  ;;  %v1749_v52 = vld [vmem:[%s2959_s10 + $0x10] sm:$0xff] }
 0x9af   :  { %1157 = vst.msk [vmem:[%s2961_s12 + $0x8] sm:$0xff] %vm314_vm2, %v1156_v53  ;;  %2179 = vmatmul.mubr.msk.f32.vlgmr.msra.gmra.mrb[18].mxu0 %vm314_vm2, %v1156_v53  ;;  %2190 = vmatmul.mubr.msk.f32.vlgmr.msra.gmra.mrb[18].mxu1 %vm314_vm2, %v1156_v53 }
 0x9b0   :  { %2348 = vmatpush3.bf16.msra.mxu0 %v2568_v7  ;;  %2354 = vmatpush3.bf16.msra.mxu1 %v2604_v20 }
 0x9b1   :  { %2349 = vmatprep.subr.bf16.mxu0 %v2471_v10  ;;  %2355 = vmatprep.subr.bf16.mxu1 %v2471_v10 }
 0x9b2   :  { %2200 = vmatprep.mubr.msk.f32.mxu0 %vm2472_vm1, %v2473_v27  ;;  %2211 = vmatprep.mubr.msk.f32.mxu1 %vm2472_vm1, %v2473_v27 }
 0x9b4   :  { %2351 = vmatpush3.bf16.msra.mxu0 %v2598_v18  ;;  %2357 = vmatpush3.bf16.msra.mxu1 %v2626_v25 }
 0x9b5   :  { %2358 = vmatprep.subr.bf16.mxu0 %v2471_v10  ;;  %2364 = vmatprep.subr.bf16.mxu1 %v2471_v10 }
 0xa82   :  { %v1227_v57 = vpop.f32.mrb[18].mxu0  ;;  %v1297_v55 = vpop.f32.mrb[18].mxu1 }
 0xa83   :  { %v1301_v56 = vadd.f32 %v1227_v57, %v2674_v41  ;;  %v2180_v58 = vpop.f32.mrb[19].mxu0  ;;  %v2191_v59 = vpop.f32.mrb[19].mxu1  ;;  %v1298_v1 = vadd.f32 %v2697_v5, %v1297_v55  ;;  %v1750_v57 = vld [vmem:[%s2959_s10 + $0x18] sm:$0xff] }
 0xa84   :  { %v2380_v58 = vpack.c.bf16 %v1750_v57, %v1749_v52  ;;  %v1751_v59 = vld [vmem:[%s2959_s10 + $0x20] sm:$0xff] }
 0xa85   :  { %v1903_v60 = vmul.f32 -1.442695, %v1301_v56 }
 0xa87   :  { %2425 = vpow2.f32 %v1903_v60  ;;  %v1752_v60 = vld [vmem:[%s2959_s10 + $0x28] sm:$0xff] }
 0xa91   :  { %v2426_v61 = vpop.eup %2425 }
 0xa92   :  { %v1305_v63 = vadd.f32 1.0, %v2426_v61  ;;  %v2383_v61 = vpack.c.bf16 %v1752_v60, %v1751_v59 }
 0xa94   :  { %2427 = vrcp.f32 %v1305_v63 }
 0xa9e   :  { %v2428_v2 = vpop.eup %2427 }
 0xa9f   :  { %v1308_v36 = vmul.f32 %v2428_v2, %v1298_v1 }
 0xaa1   :  { %v1309_v3 = vadd.f32 %v1308_v36, %v2686_v54 }
 0xaa3   :  { %2429 = vtanh.f32 %v1309_v3  ;;  %v1754_v3 = vld [vmem:[%s2959_s10 + $0x38] sm:$0xff] }
 0xaad   :  { %v2430_v4 = vpop.eup %2429 }
 0xaae   :  { %v1311_v48 = vsub.f32 %v1156_v53, %v2430_v4  ;;  %v2377_v53 = vpack.c.bf16 %v1748_v50, %v1747_v43 }
 0xab0   :  { %1313 = vrot.lane.b32.xlu0 %v1311_v48, %s2474_s29  ;;  %v1910_v48 = vld [vmem:[%s2958_s9] ss:$0 sm:$0xff] }
 0xb22   :  { %v1314_v8 = vpop.permute.xlu0 %1313 }
 0xb23   :  { %v1316_v41 = vmul.f32 %v2428_v2, %v1314_v8 }
 0xb25   :  { %1318 = vrot.lane.b32.xlu1 %v1316_v41, %s2475_s30 }
 0xb97   :  { %v1319_v9 = vpop.permute.xlu1 %1318 }
 0xb98   :  { %v2820_v11 = vadd.f32 %v2430_v4, %v1319_v9 }
 0xb9a   :  { %2201 = vmatmul.mubr.msk.f32.vlgmr.msra.gmra.mrb[20].mxu0 %vm314_vm2, %v2820_v11  ;;  %2212 = vmatmul.mubr.msk.f32.vlgmr.msra.gmra.mrb[20].mxu1 %vm314_vm2, %v2820_v11 }
 0xb9b   :  { %2360 = vmatpush3.bf16.msra.mxu0 %v2568_v7  ;;  %2366 = vmatpush3.bf16.msra.mxu1 %v2604_v20 }
 0xb9c   :  { %2361 = vmatprep.subr.bf16.mxu0 %v2471_v10  ;;  %2367 = vmatprep.subr.bf16.mxu1 %v2471_v10 }
 0xb9d   :  { %2222 = vmatprep.mubr.msk.f32.mxu0 %vm2472_vm1, %v2473_v27  ;;  %2233 = vmatprep.mubr.msk.f32.mxu1 %vm2472_vm1, %v2473_v27 }
 0xb9f   :  { %2363 = vmatpush3.bf16.msra.mxu0 %v2598_v18  ;;  %2369 = vmatpush3.bf16.msra.mxu1 %v2626_v25 }
 0xba0   :  { %2370 = vmatprep.subr.bf16.mxu0 %v2471_v10  ;;  %2376 = vmatprep.subr.bf16.mxu1 %v2471_v10 }
 0xc6d   :  { %v1395_v7 = vpop.f32.mrb[20].mxu0  ;;  %v1465_v20 = vpop.f32.mrb[20].mxu1 }
 0xc6e   :  { %v1469_v54 = vadd.f32 %v1395_v7, %v2684_v51  ;;  %v2202_v12 = vpop.f32.mrb[21].mxu0  ;;  %v2213_v13 = vpop.f32.mrb[21].mxu1  ;;  %v1466_v17 = vadd.f32 %v2697_v5, %v1465_v20  ;;  %v1912_v7 = vld [vmem:[%s2960_s11] ss:$0 sm:$0xff] }
 0xc70   :  { %v1906_v14 = vmul.f32 -1.442695, %v1469_v54 }
 0xc72   :  { %2431 = vpow2.f32 %v1906_v14 }
 0xc7c   :  { %v2432_v15 = vpop.eup %2431 }
 0xc7d   :  { %v1473_v16 = vadd.f32 1.0, %v2432_v15 }
 0xc7f   :  { %2433 = vrcp.f32 %v1473_v16 }
 0xc89   :  { %v2434_v18 = vpop.eup %2433 }
 0xc8a   :  { %v1476_v19 = vmul.f32 %v2434_v18, %v1466_v17 }
 0xc8c   :  { %v1477_v25 = vadd.f32 %v1476_v19, %v2692_v0 }
 0xc8e   :  { %2435 = vtanh.f32 %v1477_v25 }
 0xc98   :  { %v2436_v21 = vpop.eup %2435 }
 0xc99   :  { %v1479_v22 = vsub.f32 %v2820_v11, %v2436_v21 }
 0xc9b   :  { %1481 = vrot.lane.b32.xlu0 %v1479_v22, %s2474_s29 }
 0xd0d   :  { %v1482_v51 = vpop.permute.xlu0 %1481 }
 0xd0e   :  { %v1484_v23 = vmul.f32 %v2434_v18, %v1482_v51 }
 0xd10   :  { %1486 = vrot.lane.b32.xlu1 %v1484_v23, %s2475_s30 }
 0xd82   :  { %v1487_v34 = vpop.permute.xlu1 %1486 }
 0xd83   :  { %v1489_v24 = vadd.f32 %v2436_v21, %v1487_v34 }
 0xd85   :  { %2223 = vmatmul.mubr.msk.f32.vlgmr.msra.gmra.mrb[22].mxu0 %vm314_vm2, %v1489_v24  ;;  %2234 = vmatmul.mubr.msk.f32.vlgmr.msra.gmra.mrb[22].mxu1 %vm314_vm2, %v1489_v24 }
 0xd86   :  { %2244 = vmatprep.mubr.msk.f32.mxu0 %vm2472_vm1, %v2473_v27  ;;  %2263 = vmatprep.mubr.msk.f32.mxu1 %vm2472_vm1, %v2473_v27  ;;  %v1663_v27 = vld [vmem:[%s2957_s8] sm:$0xff] }
 0xd87   :  { %2378 = vmatpush3.bf16.msra.mxu1 %v2377_v53 }
 0xd88   :  { %2379 = vmatprep.subr.bf16.mxu1 %v2471_v10 }
 0xd8b   :  { %2381 = vmatpush3.bf16.msra.mxu1 %v2380_v58 }
 0xd8c   :  { %2382 = vmatprep.subr.bf16.mxu1 %v2471_v10 }
 0xd8f   :  { %2384 = vmatpush3.bf16.msra.mxu1 %v2383_v61 }
 0xd90   :  { %2385 = vmatprep.subr.bf16.mxu1 %v2471_v10 }
 0xe58   :  { %v1563_v0 = vpop.f32.mrb[22].mxu0  ;;  %v1633_v26 = vpop.f32.mrb[22].mxu1 }
 0xe59   :  { %v1637_v45 = vadd.f32 %v1563_v0, %v2682_v49  ;;  %v2224_v29 = vpop.f32.mrb[23].mxu0  ;;  %v2235_v31 = vpop.f32.mrb[23].mxu1  ;;  %v1634_v37 = vadd.f32 %v2697_v5, %v1633_v26  ;;  %v1664_v49 = vld [vmem:[%s2957_s8 + $0x8] sm:$0xff] }
 0xe5a   :  { %v2371_v5 = vpack.c.bf16 %v1664_v49, %v1663_v27 }
 0xe5b   :  { %v1909_v32 = vmul.f32 -1.442695, %v1637_v45 }
 0xe5c   :  { %2372 = vmatpush3.bf16.msra.mxu0 %v2371_v5 }
 0xe5d   :  { %2437 = vpow2.f32 %v1909_v32  ;;  %2373 = vmatprep.subr.bf16.mxu0 %v2471_v10  ;;  %v1753_v10 = vld [vmem:[%s2959_s10 + $0x30] sm:$0xff] }
 0xe5e   :  { %v2386_v4 = vpack.c.bf16 %v1754_v3, %v1753_v10 }
 0xe60   :  { %2387 = vmatpush3.bf16.msra.mxu1 %v2386_v4 }
 0xe67   :  { %v2438_v33 = vpop.eup %2437 }
 0xe68   :  { %v1641_v35 = vadd.f32 1.0, %v2438_v33 }
 0xe6a   :  { %2439 = vrcp.f32 %v1641_v35 }
 0xe74   :  { %v2440_v39 = vpop.eup %2439 }
 0xe75   :  { %v1644_v40 = vmul.f32 %v2440_v39, %v1634_v37 }
 0xe77   :  { %v1645_v42 = vadd.f32 %v1644_v40, %v2690_v62  ;;  %v1666_v62 = vld [vmem:[%s2957_s8 + $0x18] sm:$0xff]  ;;  %s1859_s8 = sshll.u32 %s2477_s0, 4  ;;  %s1860_s8 = int_to_ptr.vmem [resolvable:$true] %s1859_s8 }
 0xe78   :  { %v2374_v47 = vpack.c.bf16 %v1666_v62, %v1665_v44  ;;  %s2447_s26 = scalar_lea.vmem %s1860_s8, 128  ;;  %p2452_p1 = scmp.lt.s32.totalorder %s1860_s8, %s1860_s8 }
 0xe79   :  { %2441 = vtanh.f32 %v1645_v42  ;;  %p2448_p0 = scmp.ne.s32.totalorder %s1860_s8, %s2447_s26  ;;  %p2453_p2 = scmp.lt.s32.totalorder %s2447_s26, %s2447_s26 }
 0xe7a   :  { %2375 = vmatpush3.bf16.msra.mxu0 %v2374_v47 }
 0xe7b   :  { %p2454_p3 = por %p2453_p2, %p2452_p1 }
 0xe7d   :  { %p2455_p4 = pnand %p2454_p3, %p2448_p0 }
 0xe83   :  { %v2442_v30 = vpop.eup %2441 }
 0xe84   :  { %v1647_v38 = vsub.f32 %v1489_v24, %v2442_v30 }
 0xe86   :  { %1649 = vrot.lane.b32.xlu0 %v1647_v38, %s2474_s29 }
 0xef8   :  { %v1650_v55 = vpop.permute.xlu0 %1649 }
 0xef9   :  { %v1652_v56 = vmul.f32 %v2440_v39, %v1650_v55 }
 0xefb   :  { %1654 = vrot.lane.b32.xlu1 %v1652_v56, %s2475_s30 }
 0xeff   :  { %1323 = vrot.lane.b32.xlu1 %v2820_v11, %s2474_s29 }
 0xf03   :  { %1491 = vrot.lane.b32.xlu1 %v1489_v24, %s2476_s7 }
 0xf6d   :  { %v1655_v63 = vpop.permute.xlu1 %1654 }
 0xf6e   :  { %v1657_v1 = vadd.f32 %v2442_v30, %v1655_v63 }
 0xf70   :  { %2245 = vmatmul.mubr.msk.f32.vlgmr.msra.gmra.mrb[24].mxu0 %vm314_vm2, %v1657_v1 }
 0xf71   :  { %v1324_v2 = vpop.permute.xlu1 %1323 }
 0xf72   :  { %1326 = vst.msk [vmem:[%s2961_s12 + $0x8] sm:$0xff] %vm654_vm3, %v1324_v2 }
 0xf75   :  { %v1492_v36 = vpop.permute.xlu1 %1491 }
 0xf76   :  { %1494 = vst.msk [vmem:[%s2961_s12 + $0x8] sm:$0xff] %vm823_vm4, %v1492_v36 }
0x1043   :  { %v1742_v8 = vpop.f32.mrb[24].mxu0 }
0x1044   :  { %v1743_v41 = vadd.f32 %v1910_v48, %v1742_v8  ;;  %v2246_v9 = vpop.f32.mrb[25].mxu0 }
0x1046   :  { %v1746_v11 = vmax.f32 %v1743_v41, 0.0 }
0x1048   :  { %2264 = vmatmul.mubr.msk.f32.vlgmr.msra.gmra.mrb[24].mxu1 %vm1762_vm5, %v1746_v11 }
0x111b   :  { %v1832_v20 = vpop.f32.mrb[24].mxu1 }
0x111c   :  { %v1833_v54 = vadd.f32 %v1912_v7, %v1832_v20  ;;  %v2265_v12 = vpop.f32.mrb[25].mxu1 }
0x111e   :  { %v1837_v13 = vsel %vm1836_vm6, %v1833_v54, -inf }
0x111f   :  { %1838 = vmax.xlane.f32.xlu0 %v1837_v13 }
0x1135   :  { %651 = vrot.lane.b32.xlu0 %v2725_v46, %s2474_s29 }
0x1139   :  { %820 = vrot.lane.b32.xlu0 %v2749_v6, %s2476_s7 }
0x113d   :  { %989 = vrot.lane.b32.xlu0 %v2773_v28, %s2475_s30 }
0x11ac   :  { %v1839_v14 = vpop.xlane.xlu0 %1838 }
0x11ad   :  { %v1840_v15 = vsub.f32 %v1833_v54, %v1839_v14 }
0x11af   :  { %v1841_v16 = vmul.f32 1.442695, %v1840_v15 }
0x11b0   :  { %v652_v17 = vpop.permute.xlu0 %651 }
0x11b1   :  { %2443 = vpow2.f32 %v1841_v16  ;;  %655 = vst.msk [vmem:[%s2961_s12] sm:$0xff] %vm654_vm3, %v652_v17 }
0x11b4   :  { %v821_v18 = vpop.permute.xlu0 %820 }
0x11b5   :  { %824 = vst.msk [vmem:[%s2961_s12] sm:$0xff] %vm823_vm4, %v821_v18 }
0x11b8   :  { %v990_v46 = vpop.permute.xlu0 %989 }
0x11b9   :  { %993 = vst.msk [vmem:[%s2961_s12] sm:$0xff] %vm992_vm7, %v990_v46 }
0x11bb   :  { %v2444_v6 = vpop.eup %2443 }
0x11bc   :  { %v1843_v28 = vsel %vm1836_vm6, %v2444_v6, 0.0 }
0x11bd   :  { %1844 = vadd.xlane.f32.xlu1 %v1843_v28 }
0x11ce   :  { %1659 = vrot.lane.b32.xlu1 %v1657_v1, %s2475_s30 }
0x124a   :  { %v1845_v19 = vpop.xlane.xlu1 %1844 }
0x124b   :  { %2445 = vlog2.f32 %v1845_v19 }
0x124e   :  { %v1660_v25 = vpop.permute.xlu1 %1659 }
0x124f   :  { %1662 = vst.msk [vmem:[%s2961_s12 + $0x8] sm:$0xff] %vm992_vm7, %v1660_v25 }
0x1255   :  { %v2446_v21 = vpop.eup %2445 }
0x1256   :  { %v1847_v22 = vmul.f32 0.6931472, %v2446_v21 }
0x1258   :  { %v1848_v51 = vadd.f32 %v1847_v22, %v1839_v14 }
0x125a   :  { %v1849_v23 = vsub.f32 %v1833_v54, %v1848_v51 }
0x125c   :  { %1850 = vst.msk [vmem:[#allocation2] sm:$0xff] %vm1836_vm6, %v1849_v23 }
0x125d   :  { %2458 = shalt.err (!%p2455_p4)
}
0x125e   :  { %s2459_s12 = scalar_lea.hbm %s2962_s13, 128 }
0x125f   :  { %p2460_p5 = scmp.ne.s32.totalorder %s2962_s13, %s2459_s12  ;;  %p2463_p6 = scmp.lt.u32.totalorder %s2459_s12, %s2962_s13 }
0x1261   :  { %p2465_p7 = pnand %p2463_p6, %p2460_p5 }
0x1263   :  { %2468 = shalt.err (!%p2465_p7)
}
0x1264   :  { %1862 = dma.vmem_to_hbm [thread:$0]  %s1860_s8, 128, %s2962_s13, [#allocation3]  }
0x1265   :  { %2469 = dma.done.wait [#allocation3], 128  }
0x1266   :  { %2470 = vsyncadd [#allocation3], 4294967168 }
0x1267   :  { %1868 = vsyncpa [#allocation3], 1 }

</bundles_post_ra>
